<compile_context>
chip_gen: v7x
topology: tpu7x:2x2x1
jax: 0.10.0
libtpu: 0.0.40
codegen_flags: <defaults>
</compile_context>

<pallas_src>
import jax
import jax.numpy as jnp
from jax.experimental import pallas as pl
from jax.experimental.pallas import tpu as pltpu


def _round_up(x: int, m: int) -> int:
    return ((x + m - 1) // m) * m


def _make_nonlin_kernel(V: int, dim_in: int, dim_out: int, scalar_dim_in: int,
                        scalar_dim_out: int, d_tot: int, out_pad: int,
                        eps: float = 1e-5):
    """Builds the Pallas kernel body (all sizes are static Python ints)."""
    vd_in = V * dim_in
    vd_out = V * dim_out
    tail_pad = out_pad - (vd_out + scalar_dim_out)

    def kernel(in_ref, wn_ref, ws_ref, gb_ref, out_ref):
        slab = in_ref[...].astype(jnp.float32)          # (TB, in_pad), lane-dense
        vec = slab[:, 0:vd_in]                          # (TB, V*dim_in)
        sca = slab[:, vd_in:vd_in + scalar_dim_in]      # (TB, Sin)

        # torch.norm(vector, dim=-2) from static lane slices of the flat block.
        sumsq = vec[:, 0:dim_in] * vec[:, 0:dim_in]
        for c in range(1, V):
            vc = vec[:, c * dim_in:(c + 1) * dim_in]
            sumsq = sumsq + vc * vc
        norm = jnp.sqrt(sumsq)                          # (TB, dim_in)

        # Linear (no bias): split matmul replaces concat([norm, scalar]) @ W.
        y = jnp.dot(norm, wn_ref[...].astype(jnp.float32),
                    preferred_element_type=jnp.float32)
        y = y + jnp.dot(sca, ws_ref[...].astype(jnp.float32),
                        preferred_element_type=jnp.float32)   # (TB, d_pad)
        y = jnp.maximum(y, 0.0)                         # ReLU

        # LayerNorm over the REAL d_tot features. Lanes >= d_tot are exactly zero
        # after ReLU (zero-padded W columns, no bias), so plain lane sums scaled by
        # 1/d_tot are unbiased -> no iota/where mask needed.
        inv_d = jnp.float32(1.0 / d_tot)
        mean = jnp.sum(y, axis=-1, keepdims=True) * inv_d
        ex2 = jnp.sum(y * y, axis=-1, keepdims=True) * inv_d
        var = ex2 - mean * mean
        y = (y - mean) * jax.lax.rsqrt(var + eps)
        gb = gb_ref[...].astype(jnp.float32)            # (2, d_pad)
        y = y * gb[0:1, :] + gb[1:2, :]

        # vector / norm.clamp(min=1e-6): rsqrt(max(sumsq, 1e-12)) == 1/max(norm,1e-6)
        # and runs in the EUP slot (effectively free here).
        inv_norm = jax.lax.rsqrt(jnp.maximum(sumsq, jnp.float32(1e-12)))
        scale = y[:, :dim_out] * inv_norm               # (TB, dim_out); dim_out == dim_in
        scale_rep = jnp.concatenate([scale] * V, axis=-1)   # (TB, V*dim_out)
        out_main = vec * scale_rep

        # Single lane-dense (TB, out_pad) store: [vec*scale | scalar head | zeros].
        parts = [out_main]
        if scalar_dim_out > 0:
            parts.append(y[:, dim_out:dim_out + scalar_dim_out])
        if tail_pad > 0:
            parts.append(jnp.zeros((out_main.shape[0], tail_pad), jnp.float32))
        out_ref[...] = jnp.concatenate(parts, axis=-1).astype(out_ref.dtype)

    return kernel


def nonlinearity_forward(vector, scalar, w_t, gamma, beta,
                         dim_out: int, scalar_dim_out: int,
                         *, batch_tile: int = 512):
    """Pallas-backed forward of NonLinearity.

    vector: (B, V, dim_in) float32
    scalar: (B, scalar_dim_in) float32
    w_t:    (dim_in + scalar_dim_in, dim_out + scalar_dim_out)  (nn.Linear W, transposed)
    gamma, beta: (dim_out + scalar_dim_out,)
    """
    B, V, dim_in = vector.shape
    s_in = scalar.shape[-1]
    d_tot = dim_out + scalar_dim_out
    assert w_t.shape == (dim_in + s_in, d_tot)
    # The PyTorch broadcast x[..., :dim_out] * (vector / norm) requires this.
    assert dim_out == dim_in, "NonLinearity forward requires dim_out == dim_in"

    dtype = vector.dtype

    # ----- lane padding (all feature-ish dims padded to 128 lanes) -----
    d_pad = _round_up(d_tot, 128)
    in_width = V * dim_in + s_in
    in_pad = _round_up(in_width, 128)
    out_width = V * dim_out + scalar_dim_out
    out_pad = _round_up(out_width, 128)

    # ----- batch padding & generation-friendly grid -----
    # Pad B up (multiple of 8) rather than shrinking tiles; 1 tile for tiny
    # batches, 2 "parallel" tiles otherwise (both v7x TCs; near-free on v5e/v6e),
    # capped at `batch_tile` rows/tile for very large B.
    if B <= 8:
        B_pad = _round_up(B, 8)
        tb = B_pad
    elif _round_up(B, 16) // 2 <= batch_tile:
        B_pad = _round_up(B, 16)
        tb = B_pad // 2
    else:
        tb = _round_up(batch_tile, 8)
        B_pad = _round_up(B, tb)
    grid = (B_pad // tb,)

    # ----- pack inputs into lane-dense slabs (zero padding) -----
    slab = jnp.zeros((B_pad, in_pad), dtype)
    slab = slab.at[:B, :V * dim_in].set(vector.reshape(B, V * dim_in))
    slab = slab.at[:B, V * dim_in:V * dim_in + s_in].set(scalar.astype(dtype))

    wn = jnp.zeros((dim_in, d_pad), w_t.dtype).at[:, :d_tot].set(w_t[:dim_in])
    ws = jnp.zeros((s_in, d_pad), w_t.dtype).at[:, :d_tot].set(w_t[dim_in:])
    gb = jnp.zeros((2, d_pad), gamma.dtype)
    gb = gb.at[0, :d_tot].set(gamma).at[1, :d_tot].set(beta)

    kernel = _make_nonlin_kernel(V, dim_in, dim_out, s_in, scalar_dim_out,
                                 d_tot, out_pad)

    out_slab = pl.pallas_call(
        kernel,
        out_shape=jax.ShapeDtypeStruct((B_pad, out_pad), dtype),
        grid_spec=pltpu.PrefetchScalarGridSpec(
            num_scalar_prefetch=0,
            grid=grid,
            in_specs=[
                pl.BlockSpec((tb, in_pad), lambda i: (i, 0)),
                pl.BlockSpec((dim_in, d_pad), lambda i: (0, 0)),
                pl.BlockSpec((s_in, d_pad), lambda i: (0, 0)),
                pl.BlockSpec((2, d_pad), lambda i: (0, 0)),
            ],
            out_specs=pl.BlockSpec((tb, out_pad), lambda i: (i, 0)),
        ),
        compiler_params=pltpu.CompilerParams(
            dimension_semantics=("parallel",)),
    )(slab, wn, ws, gb)

    outv = out_slab[:B, :V * dim_out].reshape(B, V, dim_out)
    if scalar_dim_out > 0:
        outs = out_slab[:B, V * dim_out:V * dim_out + scalar_dim_out]
        return outv, outs
    return outv


def nonlinearity_reference(vector, scalar, w_t, gamma, beta,
                           dim_out, scalar_dim_out, eps=1e-5):
    """Pure-JAX reference mirroring the PyTorch forward."""
    norm = jnp.sqrt(jnp.sum(vector * vector, axis=-2))
    x = jnp.concatenate([norm, scalar], axis=-1)
    y = x @ w_t
    y = jnp.maximum(y, 0.0)
    mean = jnp.mean(y, axis=-1, keepdims=True)
    var = jnp.mean((y - mean) ** 2, axis=-1, keepdims=True)
    y = (y - mean) / jnp.sqrt(var + eps) * gamma + beta
    vdir = vector / jnp.clip(norm, 1e-6, None)[..., None, :]
    outv = y[..., None, :dim_out] * vdir
    if scalar_dim_out == 0:
        return outv
    return outv, y[..., -scalar_dim_out:]


if __name__ == "__main__":
    # Module hyper-params (dim_out must equal dim_in for the broadcast to be valid).
    dim_in = 32
    dim_out = 32
    scalar_dim_in = 16
    scalar_dim_out = 8
    B, V = 128, 2   # padded/tiled into 2 "parallel" batch tiles of 64 rows

    key = jax.random.PRNGKey(0)
    kv, ks, kw = jax.random.split(key, 3)

    vector = jax.random.normal(kv, (B, V, dim_in), dtype=jnp.float32)
    scalar = jax.random.normal(ks, (B, scalar_dim_in), dtype=jnp.float32)

    # Deterministic synthetic parameters (nn.Linear weight is (out, in); pass W.T).
    w = jax.random.normal(kw, (dim_out + scalar_dim_out,
                               dim_in + scalar_dim_in), dtype=jnp.float32) * 0.1
    w_t = w.T
    gamma = jnp.ones((dim_out + scalar_dim_out,), dtype=jnp.float32)
    beta = jnp.zeros((dim_out + scalar_dim_out,), dtype=jnp.float32)

    out_vec, out_sca = nonlinearity_forward(
        vector, scalar, w_t, gamma, beta, dim_out, scalar_dim_out)
    out_vec = jax.block_until_ready(out_vec)
    out_sca = jax.block_until_ready(out_sca)

    ref_vec, ref_sca = nonlinearity_reference(
        vector, scalar, w_t, gamma, beta, dim_out, scalar_dim_out)

    assert out_vec.shape == (B, V, dim_out)
    assert out_sca.shape == (B, scalar_dim_out)
    # Split matmul + E[x^2]-mean^2 variance reorder f32 accumulation slightly
    # vs the single-dot reference -> allow a small numerical margin.
    assert jnp.allclose(out_vec, ref_vec, atol=1e-4, rtol=1e-4)
    assert jnp.allclose(out_sca, ref_sca, atol=1e-4, rtol=1e-4)

    print("KERNEL_OK")
</pallas_src>

<mosaic_0001>
module attributes {stable_mosaic.version = 11 : i64} {
  func.func @kernel(%arg0: i32, %arg1: memref<64x128xf32, #tpu.memory_space<vmem>>, %arg2: memref<32x128xf32, #tpu.memory_space<vmem>>, %arg3: memref<16x128xf32, #tpu.memory_space<vmem>>, %arg4: memref<2x128xf32, #tpu.memory_space<vmem>>, %arg5: memref<64x128xf32, #tpu.memory_space<vmem>>) attributes {dimension_semantics = [#tpu.dimension_semantics<parallel>], iteration_bounds = array<i64: 2>, scalar_prefetch = 0 : i64, scratch_operands = 0 : i64, tpu.core_type = #tpu.core_type<tc>, window_params = [{transform_indices = @transform_0, window_bounds = array<i64: 64, 128>}, {pipeline_mode = #tpu.pipeline_mode<synchronous>, transform_indices = @transform_1, window_bounds = array<i64: 32, 128>}, {pipeline_mode = #tpu.pipeline_mode<synchronous>, transform_indices = @transform_2, window_bounds = array<i64: 16, 128>}, {pipeline_mode = #tpu.pipeline_mode<synchronous>, transform_indices = @transform_3, window_bounds = array<i64: 2, 128>}, {transform_indices = @transform_4, window_bounds = array<i64: 64, 128>}]} {
    %c0 = arith.constant 0 : index
    %c0_0 = arith.constant 0 : index
    %0 = vector.load %arg1[%c0, %c0_0] : memref<64x128xf32, #tpu.memory_space<vmem>>, vector<64x128xf32>
    %1 = vector.extract_strided_slice %0 {offsets = [0, 0], sizes = [64, 64], strides = [1, 1]} : vector<64x128xf32> to vector<64x64xf32>
    %2 = vector.extract_strided_slice %0 {offsets = [0, 64], sizes = [64, 16], strides = [1, 1]} : vector<64x128xf32> to vector<64x16xf32>
    %3 = vector.extract_strided_slice %1 {offsets = [0, 0], sizes = [64, 32], strides = [1, 1]} : vector<64x64xf32> to vector<64x32xf32>
    %4 = vector.extract_strided_slice %1 {offsets = [0, 0], sizes = [64, 32], strides = [1, 1]} : vector<64x64xf32> to vector<64x32xf32>
    %5 = arith.mulf %3, %4 : vector<64x32xf32>
    %6 = vector.extract_strided_slice %1 {offsets = [0, 32], sizes = [64, 32], strides = [1, 1]} : vector<64x64xf32> to vector<64x32xf32>
    %7 = arith.mulf %6, %6 : vector<64x32xf32>
    %8 = arith.addf %5, %7 : vector<64x32xf32>
    %9 = math.sqrt %8 : vector<64x32xf32>
    %c0_1 = arith.constant 0 : index
    %c0_2 = arith.constant 0 : index
    %10 = vector.load %arg2[%c0_1, %c0_2] : memref<32x128xf32, #tpu.memory_space<vmem>>, vector<32x128xf32>
    %cst = arith.constant dense<0.000000e+00> : vector<64x128xf32>
    %11 = tpu.matmul %9, %10, %cst {dimension_numbers = #tpu.dot_dimension_numbers<[1], [0], [0], [1], [0, 0, 1, 1], [], []>} : vector<64x32xf32>, vector<32x128xf32>, vector<64x128xf32> -> vector<64x128xf32>
    %c0_3 = arith.constant 0 : index
    %c0_4 = arith.constant 0 : index
    %12 = vector.load %arg3[%c0_3, %c0_4] : memref<16x128xf32, #tpu.memory_space<vmem>>, vector<16x128xf32>
    %cst_5 = arith.constant dense<0.000000e+00> : vector<64x128xf32>
    %13 = tpu.matmul %2, %12, %cst_5 {dimension_numbers = #tpu.dot_dimension_numbers<[1], [0], [0], [1], [0, 0, 1, 1], [], []>} : vector<64x16xf32>, vector<16x128xf32>, vector<64x128xf32> -> vector<64x128xf32>
    %14 = arith.addf %11, %13 : vector<64x128xf32>
    %cst_6 = arith.constant 0.000000e+00 : f32
    %15 = vector.broadcast %cst_6 : f32 to vector<64x128xf32>
    %16 = arith.maximumf %14, %15 : vector<64x128xf32>
    %cst_7 = arith.constant dense<0.000000e+00> : vector<64xf32>
    %17 = vector.multi_reduction <add>, %16, %cst_7 [1] : vector<64x128xf32> to vector<64xf32>
    %18 = vector.shape_cast %17 : vector<64xf32> to vector<64x1xf32>
    %cst_8 = arith.constant 2.500000e-02 : f32
    %19 = vector.broadcast %cst_8 : f32 to vector<64x1xf32>
    %20 = arith.mulf %18, %19 : vector<64x1xf32>
    %21 = arith.mulf %16, %16 : vector<64x128xf32>
    %cst_9 = arith.constant dense<0.000000e+00> : vector<64xf32>
    %22 = vector.multi_reduction <add>, %21, %cst_9 [1] : vector<64x128xf32> to vector<64xf32>
    %23 = vector.shape_cast %22 : vector<64xf32> to vector<64x1xf32>
    %cst_10 = arith.constant 2.500000e-02 : f32
    %24 = vector.broadcast %cst_10 : f32 to vector<64x1xf32>
    %25 = arith.mulf %23, %24 : vector<64x1xf32>
    %26 = arith.mulf %20, %20 : vector<64x1xf32>
    %27 = arith.subf %25, %26 : vector<64x1xf32>
    %28 = vector.broadcast %20 : vector<64x1xf32> to vector<64x128xf32>
    %29 = arith.subf %16, %28 : vector<64x128xf32>
    %cst_11 = arith.constant 9.99999974E-6 : f32
    %30 = vector.broadcast %cst_11 : f32 to vector<64x1xf32>
    %31 = arith.addf %27, %30 : vector<64x1xf32>
    %32 = math.rsqrt %31 : vector<64x1xf32>
    %33 = vector.broadcast %32 : vector<64x1xf32> to vector<64x128xf32>
    %34 = arith.mulf %29, %33 : vector<64x128xf32>
    %c0_12 = arith.constant 0 : index
    %c0_13 = arith.constant 0 : index
    %35 = vector.load %arg4[%c0_12, %c0_13] : memref<2x128xf32, #tpu.memory_space<vmem>>, vector<2x128xf32>
    %36 = vector.extract_strided_slice %35 {offsets = [0, 0], sizes = [1, 128], strides = [1, 1]} : vector<2x128xf32> to vector<1x128xf32>
    %37 = vector.broadcast %36 : vector<1x128xf32> to vector<64x128xf32>
    %38 = arith.mulf %34, %37 : vector<64x128xf32>
    %39 = vector.extract_strided_slice %35 {offsets = [1, 0], sizes = [1, 128], strides = [1, 1]} : vector<2x128xf32> to vector<1x128xf32>
    %40 = vector.broadcast %39 : vector<1x128xf32> to vector<64x128xf32>
    %41 = arith.addf %38, %40 : vector<64x128xf32>
    %cst_14 = arith.constant 9.99999996E-13 : f32
    %42 = vector.broadcast %cst_14 : f32 to vector<64x32xf32>
    %43 = arith.maximumf %8, %42 : vector<64x32xf32>
    %44 = math.rsqrt %43 : vector<64x32xf32>
    %45 = vector.extract_strided_slice %41 {offsets = [0, 0], sizes = [64, 32], strides = [1, 1]} : vector<64x128xf32> to vector<64x32xf32>
    %46 = arith.mulf %45, %44 : vector<64x32xf32>
    %47 = tpu.concatenate %46, %46 in 1 : vector<64x32xf32>, vector<64x32xf32> -> vector<64x64xf32>
    %48 = arith.mulf %1, %47 : vector<64x64xf32>
    %49 = vector.extract_strided_slice %41 {offsets = [0, 32], sizes = [64, 8], strides = [1, 1]} : vector<64x128xf32> to vector<64x8xf32>
    %cst_15 = arith.constant 0.000000e+00 : f32
    %50 = vector.broadcast %cst_15 : f32 to vector<64x56xf32>
    %51 = tpu.concatenate %48, %49, %50 in 1 : vector<64x64xf32>, vector<64x8xf32>, vector<64x56xf32> -> vector<64x128xf32>
    %c0_16 = arith.constant 0 : index
    %c0_17 = arith.constant 0 : index
    %52 = vector.load %arg5[%c0_16, %c0_17] : memref<64x128xf32, #tpu.memory_space<vmem>>, vector<64x128xf32>
    tpu.vector_store %arg5[%c0_16, %c0_17], %51 {strides = array<i32>} : memref<64x128xf32, #tpu.memory_space<vmem>>, vector<64x128xf32>,
    return
  }
  func.func @transform_0(%arg0: i32) -> (i32, i32) {
    %c0_i32 = arith.constant 0 : i32
    %c0_i32_0 = arith.constant 0 : i32
    return %arg0, %c0_i32 : i32, i32
  }
  func.func @transform_1(%arg0: i32) -> (i32, i32) {
    %c0_i32 = arith.constant 0 : i32
    %c0_i32_0 = arith.constant 0 : i32
    %c0_i32_1 = arith.constant 0 : i32
    return %c0_i32, %c0_i32_0 : i32, i32
  }
  func.func @transform_2(%arg0: i32) -> (i32, i32) {
    %c0_i32 = arith.constant 0 : i32
    %c0_i32_0 = arith.constant 0 : i32
    %c0_i32_1 = arith.constant 0 : i32
    return %c0_i32, %c0_i32_0 : i32, i32
  }
  func.func @transform_3(%arg0: i32) -> (i32, i32) {
    %c0_i32 = arith.constant 0 : i32
    %c0_i32_0 = arith.constant 0 : i32
    %c0_i32_1 = arith.constant 0 : i32
    return %c0_i32, %c0_i32_0 : i32, i32
  }
  func.func @transform_4(%arg0: i32) -> (i32, i32) {
    %c0_i32 = arith.constant 0 : i32
    %c0_i32_0 = arith.constant 0 : i32
    return %arg0, %c0_i32 : i32, i32
  }
}

</mosaic_0001>

<bundles_post_ra>
// kernel: tpu_custom_call.1
= control target key start
LH: loop header
LB: loop body
LE: loop exit
PB: predicated region body
PF: predicated region fallthrough
CT: control target
= control target key end

     0   :  { %9 = vsyncpa [#allocation3], 0  ;;  %s2005_s0 = inlined_call_operand.hbm [shape: f32[128,128], index: 0, kind: input, shape index: {}]   ;;  %s2006_s1 = inlined_call_operand.hbm [shape: f32[32,128], index: 1, kind: input, shape index: {}]   ;;  %s2007_s2 = inlined_call_operand.hbm [shape: f32[16,128], index: 2, kind: input, shape index: {}]   ;;  %s2008_s3 = inlined_call_operand.vmem [shape: f32[2,128], index: 3, kind: input, shape index: {}]   ;;  %s2009_s4 = inlined_call_operand.hbm [shape: f32[128,128], index: 4, kind: output, shape index: {}]  }
   0x1   :  { %11 = vsyncpa [#allocation3 + $0x1], 0 }
   0x2   :  { %12 = vsyncpa [#allocation6], 0 }
   0x3   :  { %13 = vsyncpa [#allocation4], 0 }
   0x4   :  { %15 = vsyncpa [#allocation4 + $0x1], 0  ;;  %s1444_s15 = smov 0   ;;  %s1446_s16 = smov 0  }
   0x5   :  { %s1448_s17 = smov 0   ;;  %s1450_s18 = smov 0  }
   0x6 LB: > { %s1465_s19 = sadd.s32 4294967295, %s1406_s18   ;;  %s1014_s20 = sadd.s32 4294967294, %s1406_s18   ;;  %s1406_s18 = sphi %s1450_s18, %s2029_s18   ;;  %s1402_s17 = sphi %s1448_s17, %s2028_s17   ;;  %s1398_s16 = sphi %s1446_s16, %s2027_s16   ;;  %s1394_s15 = sphi %s1444_s15, %s2026_s15  }
   0x7   : > { %p41_p0 = scmp.ne.s32.totalorder %s1398_s16, %s1394_s15  ;;  %p2010_p1 = scmp.eq.s32.totalorder %s1465_s19, 0 }
   0x8   : > { %p134_p3 = scmp.eq.s32.totalorder %s1014_s20, 1  ;;  %p1015_p5 = scmp.ge.s32.totalorder %s1406_s18, 1 }
   0x9   : > { %p1474_p4 = por %p2010_p1, %p41_p0  ;;  %p141_p7 = scmp.lt.s32.totalorder %s1406_s18, 3 }
   0xa   : > { %p1479_p6 = por %p134_p3, %p41_p0  ;;  %s1408_s24 = smov [#allocation5]  }
   0xb   : > { %s2013_s21 = scalar_select %p1474_p4, 1, 0 }
   0xc   : > { %s2014_s22 = scalar_select %p1479_p6, 1, 0 }
   0xd   : > { %p1484_p8 = pnand %p1015_p5, %p141_p7  ;;  %s153_s25 = sshll.u32 %s1408_s24, 4  ;;  %s1488_s25 = int_to_ptr.vmem [resolvable:$true] %s153_s25 }
   0xe   : > { %s1409_s27 = smov [#allocation7]   ;;  %s1250_s5 = scalar_lea.hbm %s2006_s1, 512 }
   0xf   : > { %p1140_p9 = pneg %p1484_p8  ;;  %s166_s28 = sshll.u32 %s1409_s27, 4  ;;  %s1499_s28 = int_to_ptr.vmem [resolvable:$true] %s166_s28 }
  0x10   : > { %p1251_p12 = scmp.ne.s32.totalorder %s2006_s1, %s1250_s5  ;;  %p1257_p5 = scmp.lt.u32.totalorder %s1250_s5, %s2006_s1 }
  0x11   : > { %p1495_p11 = pnand %p1140_p9, %p2010_p1 }
  0x13   : > { %p1252_p13 = pneg %p1495_p11 }
  0x15   : > { %p1253_p0 = pnand %p1252_p13, %p1251_p12 }
  0x17   : > { %p1254_p3 = pneg %p1253_p0 }
  0x19   : > { %p1259_p7 = pnand %p1257_p5, %p1254_p3 }
  0x1b   : > { %1262 = shalt.err (!%p1259_p7)
}
  0x1c   : > { %s1263_s10 = scalar_lea.vmem %s1488_s25, 512  ;;  %p1271_p2 = scmp.lt.s32.totalorder %s1488_s25, %s1488_s25 }
  0x1d   : > { %p1264_p9 = scmp.ne.s32.totalorder %s1488_s25, %s1263_s10  ;;  %p1272_p12 = scmp.lt.s32.totalorder %s1263_s10, %s1263_s10 }
  0x1f   : > { %p1266_p10 = pnand %p1264_p9, %p1252_p13  ;;  %p1273_p0 = por %p1272_p12, %p1271_p2 }
  0x21   : > { %p1267_p1 = pneg %p1266_p10 }
  0x23   : > { %p1274_p6 = pnand %p1273_p0, %p1267_p1 }
  0x25   : > { %1277 = shalt.err (!%p1274_p6)
}
  0x26   : > { %s1410_s11 = smov 128   ;;  %s1411_s12 = smov 8  }
  0x27   : > { %1143 = dma.hbm_to_vmem [thread:$0]  (!%p1495_p11), %s2006_s1, 512, %s1488_s25, [#allocation6], %s1410_s11, %s1410_s11, %s1411_s12  }
  0x28   : > { %s1278_s27 = scalar_lea.hbm %s2007_s2, 256 }
  0x29   : > { %p1279_p1 = scmp.ne.s32.totalorder %s2007_s2, %s1278_s27  ;;  %p1285_p10 = scmp.lt.u32.totalorder %s1278_s27, %s2007_s2 }
  0x2b   : > { %p1281_p2 = pnand %p1279_p1, %p1252_p13 }
  0x2d   : > { %p1282_p6 = pneg %p1281_p2 }
  0x2f   : > { %p1287_p3 = pnand %p1285_p10, %p1282_p6 }
  0x31   : > { %1290 = shalt.err (!%p1287_p3)
}
  0x32   : > { %s1291_s25 = scalar_lea.vmem %s1499_s28, 256  ;;  %p1299_p12 = scmp.lt.s32.totalorder %s1499_s28, %s1499_s28 }
  0x33   : > { %p1292_p5 = scmp.ne.s32.totalorder %s1499_s28, %s1291_s25  ;;  %p1300_p0 = scmp.lt.s32.totalorder %s1291_s25, %s1291_s25 }
  0x35   : > { %p1294_p7 = pnand %p1292_p5, %p1252_p13  ;;  %p1301_p1 = por %p1300_p0, %p1299_p12 }
  0x37   : > { %p1295_p9 = pneg %p1294_p7 }
  0x39   : > { %p1302_p2 = pnand %p1301_p1, %p1295_p9 }
  0x3b   : > { %1305 = shalt.err (!%p1302_p2)
}
  0x3c   : > { %1146 = dma.hbm_to_vmem [thread:$0]  (!%p1495_p11), %s2007_s2, 256, %s1499_s28, [#allocation6], %s1410_s11, %s1410_s11, %s1411_s12  }
  0x3d   : > { %s1560_s26 = sadd.s32 1, %s1406_s18   ;;  %s28_s9 = sadd.s32 1, %s1402_s17 }
  0x3e   : > { %s25_s10 = ssub.s32 %s1406_s18, %s1560_s26  ;;  %p35_p13 = scmp.ne.s32.totalorder %s1402_s17, %s1398_s16 }
  0x3f   : > { %p26_p6 = scmp.eq.s32.totalorder %s25_s10, 0  ;;  %p36_p10 = scmp.eq.s32.totalorder %s1406_s18, 0 }
  0x40   : > { %p2017_p3 = scmp.eq.s32.totalorder %s1465_s19, 1  ;;  %p1157_p7 = scmp.lt.s32.totalorder %s1406_s18, 2 }
  0x41   : > { %s1576_s14 = scalar_select %p26_p6, %s1402_s17, %s28_s9  }
  0x42   : > { %p1570_p5 = por %p2017_p3, %p35_p13  ;;  %p37_p9 = por %p36_p10, %p35_p13 }
  0x43   : > { %s183_s20 = sand.u32 1, %s1402_s17   ;;  %s1048_s28 = sshll.u32 %s1406_s18, 10 }
  0x44   : > { %s2018_s13 = scalar_select %p1570_p5, 1, 0 }
  0x45   : > { %s1019_s24 = sshll.u32 %s183_s20, 6  ;;  %s1583_s30 = scalar_lea.hbm %s2005_s0, %s1048_s28 }
  0x46   : > { %s187_s5 = scalar_lea.vmem [#allocation2], %s1019_s24  ;;  %p1587_p11 = pnand %p1157_p7, %p37_p9 }
  0x47   : > { %s194_s6 = sshll.u32 %s187_s5, 4  ;;  %s1591_s7 = scalar_lea.sflag [#allocation3], %s183_s20  ;;  %s1585_s6 = int_to_ptr.vmem [resolvable:$true] %s194_s6 }
  0x48   : > { %s1306_s8 = scalar_lea.hbm %s1583_s30, 1024  ;;  %p1308_p0 = pneg %p1587_p11 }
  0x49   : > { %p1307_p12 = scmp.ne.s32.totalorder %s1583_s30, %s1306_s8  ;;  %s1311_s24 = scalar_lea.hbm %s2005_s0, 2048 }
  0x4a   : > { %p1312_p13 = scmp.lt.u32.totalorder %s1583_s30, %s2005_s0  ;;  %p1313_p6 = scmp.lt.u32.totalorder %s1311_s24, %s1306_s8 }
  0x4b   : > { %p1309_p1 = pnand %p1308_p0, %p1307_p12  ;;  %p1315_p3 = scmp.lt.u32.totalorder %s1306_s8, %s1583_s30 }
  0x4c   : > { %p1314_p10 = por %p1313_p6, %p1312_p13 }
  0x4d   : > { %p1310_p2 = pneg %p1309_p1 }
  0x4e   : > { %p1316_p7 = por %p1315_p3, %p1314_p10 }
  0x50   : > { %p1317_p9 = pnand %p1316_p7, %p1310_p2 }
  0x52   : > { %1320 = shalt.err (!%p1317_p9)
}
  0x53   : > { %s1321_s20 = scalar_lea.vmem %s1585_s6, 1024  ;;  %s1412_s29 = smov [#allocation2]  }
  0x54   : > { %p1322_p12 = scmp.ne.s32.totalorder %s1585_s6, %s1321_s20  ;;  %s1326_s5 = sshll.u32 %s1412_s29, 4  ;;  %s1327_s5 = int_to_ptr.vmem [resolvable:$false] %s1326_s5 }
  0x55   : > { %s1328_s9 = scalar_lea.vmem %s1327_s5, 2048  ;;  %p1329_p4 = scmp.lt.s32.totalorder %s1585_s6, %s1327_s5 }
  0x56   : > { %p1324_p1 = pnand %p1322_p12, %p1308_p0  ;;  %p1330_p13 = scmp.lt.s32.totalorder %s1328_s9, %s1321_s20 }
  0x58   : > { %p1325_p5 = pneg %p1324_p1  ;;  %p1331_p6 = por %p1330_p13, %p1329_p4 }
  0x5a   : > { %p1332_p10 = pnand %p1331_p6, %p1325_p5 }
  0x5c   : > { %1335 = shalt.err (!%p1332_p10)
}
  0x5d   : > { %1150 = dma.hbm_to_vmem [thread:$0]  (!%p1587_p11), %s1583_s30, 1024, %s1585_s6, %s1591_s7, %s1410_s11, %s1410_s11, %s1411_s12  }
  0x5e   : > { %206 = sbr.rel (%p1484_p8) target bundleno = 799 (0x31f), region = 36  ;;  %s1625_s8 = sand.u32 (!%p1484_p8), 1, %s1398_s16  }
  0x5f   : > { %s1023_s10 = sshll.u32 (!%p1484_p8), %s1625_s8, 6  ;;  %s209_s24 = scalar_lea.sflag (!%p1484_p8), [#allocation3], %s1625_s8 }
  0x60   : > { %s1631_s25 = scalar_lea.vmem (!%p1484_p8), [#allocation2], %s1023_s10  ;;  %p2020_p4 = scmp.ne.s32.totalorder (!%p1484_p8), %s2013_s21, 0 }
  0x65   : > { %1381 = dma.done.wait (%p2020_p4), %s209_s24, 1024  }
  0x66   : > { %1383 = vsyncadd (%p2020_p4), %s209_s24, 4294966272  ;;  %p2021_p5 = scmp.eq.s32.totalorder %s1465_s19, 0 }
  0x68   : > { %1385 = dma.done.wait (%p2021_p5), [#allocation6], 768   ;;  %p2022_p8 = pmov %p2021_p5 }
  0x69   : > { %v1642_v0 = vld [vmem:[%s1631_s25 + $0x10] sm:$0xff]  ;;  %v1645_v1 = vld [vmem:[%s1631_s25] sm:$0xff]  ;;  %v1648_v2 = vld [vmem:[%s1631_s25 + $0x18] sm:$0xff]  ;;  %s1413_s21 = smov 96   ;;  %s1414_s23 = smov 64   ;;  %vm511_vm0 = vcmask 261120  }
  0x6a   : > { %1387 = vsyncadd (%p2022_p8), [#allocation6], 4294966528  ;;  %v257_v3 = vmul.f32 %v1642_v0, %v1642_v0  ;;  %v255_v4 = vmul.f32 %v1645_v1, %v1645_v1  ;;  %v1655_v5 = vld [vmem:[%s1631_s25 + $0x8] sm:$0xff]  ;;  %v359_v7 = vld [vmem:[#allocation5] sm:$0xff]  ;;  %v258_v8 = vmul.f32 %v1648_v2, %v1648_v2  ;;  %vm389_vm1 = vcmask 130048   ;;  %s1415_s30 = smov 32  }
  0x6b   : > { %v1658_v6 = vld [vmem:[%s1631_s25 + $0x28] sm:$0xff]  ;;  %v256_v9 = vmul.f32 %v1655_v5, %v1655_v5  ;;  %v363_v11 = vld [vmem:[#allocation7] sm:$0xff]  ;;  %v361_v16 = vld [vmem:[#allocation5 + $0x10] sm:$0xff]  ;;  %s1919_s6 = scalar_lea.vmem [#allocation8], %s1023_s10  ;;  %s1049_s7 = sshll.u32 %s1465_s19, 10 }
  0x6c   : > { %275 = vrot.lane.b32.xlu1 %v257_v3, %s1413_s21  ;;  %271 = vrot.lane.b32.xlu0 %v255_v4, %s1413_s21  ;;  %v360_v10 = vld [vmem:[#allocation5 + $0x8] sm:$0xff]  ;;  %v1667_v13 = vld [vmem:[%s1631_s25 + $0x20] sm:$0xff]  ;;  %v362_v17 = vld [vmem:[#allocation5 + $0x18] sm:$0xff]  ;;  %v260_v19 = vmul.f32 %v1658_v6, %v1658_v6  ;;  %s922_s28 = sshll.u32 %s1919_s6, 4  ;;  %s1956_s29 = scalar_lea.hbm %s2009_s4, %s1049_s7  ;;  %s1958_s28 = int_to_ptr.vmem [resolvable:$true] %s922_s28 }
  0x6d   : > { %v364_v12 = vld [vmem:[#allocation7 + $0x8] sm:$0xff]  ;;  %v1112_v14 = vpack.c.bf16 %v360_v10, %v359_v7  ;;  %v1116_v18 = vpack.c.bf16 %v362_v17, %v361_v16  ;;  %v259_v20 = vmul.f32 %v1667_v13, %v1667_v13  ;;  %v1676_v21 = vld [vmem:[%s1631_s25 + $0x38] sm:$0xff]  ;;  %v1679_v22 = vld [vmem:[%s1631_s25 + $0x30] sm:$0xff]  ;;  %s909_s19 = scalar_lea.sflag [#allocation4], %s1625_s8  ;;  %s1336_s5 = scalar_lea.vmem %s1958_s28, 1024 }
  0x6e   : > { %v1108_v15 = vpack.c.bf16 %v364_v12, %v363_v11  ;;  %v262_v23 = vmul.f32 %v1676_v21, %v1676_v21  ;;  %v261_v24 = vmul.f32 %v1679_v22, %v1679_v22  ;;  %p1337_p11 = scmp.ne.s32.totalorder %s1958_s28, %s1336_s5  ;;  %p2023_p0 = scmp.ne.s32.totalorder %s2018_s13, 0 }
  0x6f   : > { %1113 = vmatprep.subr.bf16.mxu0 %v1112_v14  ;;  %s1416_s9 = smov [#allocation8]  }
  0x70   : > { %1109 = vmatprep.subr.bf16.mxu1 %v1108_v15  ;;  %277 = vrot.lane.b32.xlu1 %v258_v8, %s1413_s21  ;;  %p1338_p2 = pnand %p1337_p11, %p2023_p0  ;;  %s1340_s10 = sshll.u32 %s1416_s9, 4  ;;  %s1341_s10 = int_to_ptr.vmem [resolvable:$false] %s1340_s10 }
  0x71   : > { %273 = vrot.lane.b32.xlu0 %v256_v9, %s1413_s21  ;;  %1115 = vmatpush3.bf16.msra.mxu0 %v1112_v14  ;;  %s1342_s24 = scalar_lea.vmem %s1341_s10, 2048  ;;  %p1343_p7 = scmp.lt.s32.totalorder %s1958_s28, %s1341_s10 }
  0x72   : > { %1111 = vmatpush3.bf16.msra.mxu1 %v1108_v15  ;;  %1117 = vmatprep.subr.bf16.mxu0 %v1116_v18  ;;  %p1339_p3 = pneg %p1338_p2  ;;  %p1344_p9 = scmp.lt.s32.totalorder %s1342_s24, %s1336_s5 }
  0x74   : > { %281 = vrot.lane.b32.xlu1 %v260_v19, %s1413_s21  ;;  %p1345_p12 = por %p1344_p9, %p1343_p7 }
  0x75   : > { %279 = vrot.lane.b32.xlu0 %v259_v20, %s1413_s21  ;;  %1119 = vmatpush3.bf16.msra.mxu0 %v1116_v18 }
  0x76   : > { %p1346_p1 = pnand %p1345_p12, %p1339_p3 }
  0x78   : > { %285 = vrot.lane.b32.xlu1 %v262_v23, %s1413_s21 }
  0x79   : > { %283 = vrot.lane.b32.xlu0 %v261_v24, %s1413_s21 }
  0x7c   : > { %375 = vrot.lane.b32.xlu1 %v1655_v5, %s1414_s23 }
  0x7d   : > { %373 = vrot.lane.b32.xlu0 %v1645_v1, %s1414_s23 }
  0x80   : > { %379 = vrot.lane.b32.xlu1 %v1648_v2, %s1414_s23 }
  0x81   : > { %377 = vrot.lane.b32.xlu0 %v1642_v0, %s1414_s23 }
  0x84   : > { %383 = vrot.lane.b32.xlu1 %v1658_v6, %s1414_s23 }
  0x85   : > { %381 = vrot.lane.b32.xlu0 %v1667_v13, %s1414_s23 }
  0x88   : > { %387 = vrot.lane.b32.xlu1 %v1676_v21, %s1414_s23 }
  0x89   : > { %385 = vrot.lane.b32.xlu0 %v1679_v22, %s1414_s23 }
  0xde   : > { %v276_v25 = vpop.permute.xlu1 %275  ;;  %v272_v26 = vpop.permute.xlu0 %271 }
  0xdf   : > { %v1697_v27 = vadd.f32 %v276_v25, %v257_v3  ;;  %v1699_v28 = vadd.f32 %v272_v26, %v255_v4 }
  0xe1   : > { %1202 = vrsqrt.f32 %v1699_v28  ;;  %vm305_vm2 = vcmp.eq.f32.partialorder %v1699_v28, inf  ;;  %v308_v44 = vand.u32 2147483648, %v1699_v28  ;;  %vm307_vm3 = vcmp.eq.f32.partialorder %v1699_v28, 0.0 }
  0xe2   : > { %v278_v29 = vpop.permute.xlu1 %277  ;;  %1204 = vrsqrt.f32 %v1697_v27  ;;  %vm319_vm4 = vcmp.eq.f32.partialorder %v1697_v27, inf  ;;  %v322_v57 = vand.u32 2147483648, %v1697_v27  ;;  %vm321_vm7 = vcmp.eq.f32.partialorder %v1697_v27, 0.0 }
  0xe3   : > { %v274_v30 = vpop.permute.xlu0 %273  ;;  %v1703_v31 = vadd.f32 %v278_v29, %v258_v8 }
  0xe4   : > { %v1705_v32 = vadd.f32 %v274_v30, %v256_v9 }
  0xe5   : > { %vm326_vm8 = vcmp.eq.f32.partialorder %v1703_v31, inf  ;;  %v329_v7 = vand.u32 2147483648, %v1703_v31  ;;  %vm328_vm10 = vcmp.eq.f32.partialorder %v1703_v31, 0.0 }
  0xe6   : > { %1206 = vrsqrt.f32 %v1705_v32  ;;  %v282_v33 = vpop.permute.xlu1 %281  ;;  %vm312_vm5 = vcmp.eq.f32.partialorder %v1705_v32, inf  ;;  %v315_v53 = vand.u32 2147483648, %v1705_v32  ;;  %vm314_vm6 = vcmp.eq.f32.partialorder %v1705_v32, 0.0 }
  0xe7   : > { %v280_v34 = vpop.permute.xlu0 %279  ;;  %1208 = vrsqrt.f32 %v1703_v31  ;;  %v1709_v35 = vadd.f32 %v282_v33, %v260_v19 }
  0xe8   : > { %v1711_v36 = vadd.f32 %v280_v34, %v259_v20 }
  0xe9   : > { %vm340_vm12 = vcmp.eq.f32.partialorder %v1709_v35, inf  ;;  %v343_v20 = vand.u32 2147483648, %v1709_v35  ;;  %vm342_vm14 = vcmp.eq.f32.partialorder %v1709_v35, 0.0 }
  0xea   : > { %1210 = vrsqrt.f32 %v1711_v36  ;;  %v286_v37 = vpop.permute.xlu1 %285  ;;  %vm333_vm9 = vcmp.eq.f32.partialorder %v1711_v36, inf  ;;  %v336_v8 = vand.u32 2147483648, %v1711_v36  ;;  %vm335_vm11 = vcmp.eq.f32.partialorder %v1711_v36, 0.0 }
  0xeb   : > { %v284_v38 = vpop.permute.xlu0 %283  ;;  %1212 = vrsqrt.f32 %v1709_v35  ;;  %v1203_v39 = vpop.eup %1202  ;;  %v1715_v40 = vadd.f32 %v286_v37, %v262_v23 }
  0xec   : > { %v1717_v41 = vadd.f32 %v284_v38, %v261_v24  ;;  %v1205_v42 = vpop.eup %1204  ;;  %v304_v43 = vmul.f32 %v1203_v39, %v1699_v28 }
  0xed   : > { %v318_v45 = vmul.f32 %v1205_v42, %v1697_v27  ;;  %v357_v37 = vand.u32 2147483648, %v1715_v40 }
  0xee   : > { %1214 = vrsqrt.f32 %v1717_v41  ;;  %v306_v46 = vsel %vm305_vm2, %v1699_v28, %v304_v43  ;;  %v376_v48 = vpop.permute.xlu1 %375  ;;  %vm347_vm13 = vcmp.eq.f32.partialorder %v1717_v41, inf  ;;  %v350_v23 = vand.u32 2147483648, %v1717_v41 }
  0xef   : > { %v374_v47 = vpop.permute.xlu0 %373  ;;  %1216 = vrsqrt.f32 %v1715_v40  ;;  %v309_v50 = vsel %vm307_vm3, %v308_v44, %v306_v46  ;;  %v320_v54 = vsel %vm319_vm4, %v1697_v27, %v318_v45  ;;  %vm349_vm15 = vcmp.eq.f32.partialorder %v1717_v41, 0.0 }
  0xf0   : > { %v1207_v49 = vpop.eup %1206  ;;  %1076 = vmatprep.mubr.msk.f32.mxu1 %vm389_vm1, %v374_v47  ;;  %1096 = vmatprep.mubr.msk.f32.mxu0 %vm511_vm0, %v309_v50  ;;  %v323_v63 = vsel %vm321_vm7, %v322_v57, %v320_v54  ;;  %vm354_vm2 = vcmp.eq.f32.partialorder %v1715_v40, inf  ;;  %vm356_vm3 = vcmp.eq.f32.partialorder %v1715_v40, 0.0  ;;  %vm891_vm4 = vcmask 588800  }
  0xf1   : > { %v1209_v51 = vpop.eup %1208  ;;  %1077 = vmatmul.mubr.msk.f32.vlgmr.msra.gmra.mrb[0].mxu1 %vm389_vm1, %v376_v48  ;;  %v311_v52 = vmul.f32 %v1207_v49, %v1705_v32 }
  0xf2   : > { %v325_v55 = vmul.f32 %v1209_v51, %v1703_v31  ;;  %v380_v59 = vpop.permute.xlu1 %379 }
  0xf3   : > { %v313_v56 = vsel %vm312_vm5, %v1705_v32, %v311_v52  ;;  %v378_v58 = vpop.permute.xlu0 %377 }
  0xf4   : > { %v1211_v60 = vpop.eup %1210  ;;  %v316_v61 = vsel %vm314_vm6, %v315_v53, %v313_v56  ;;  %1079 = vmatprep.mubr.msk.f32.mxu1 %vm389_vm1, %v378_v58  ;;  %v327_v3 = vsel %vm326_vm8, %v1703_v31, %v325_v55 }
  0xf5   : > { %v1213_v62 = vpop.eup %1212  ;;  %1097 = vmatmul.mubr.msk.f32.vlgmr.msra.gmra.mrb[0].mxu0 %vm511_vm0, %v316_v61  ;;  %1080 = vmatmul.mubr.msk.f32.gmra.mrb[2].mxu1 %vm389_vm1, %v380_v59  ;;  %v332_v4 = vmul.f32 %v1211_v60, %v1711_v36  ;;  %v330_v15 = vsel %vm328_vm10, %v329_v7, %v327_v3 }
  0xf6   : > { %1099 = vmatprep.mubr.msk.f32.mxu0 %vm511_vm0, %v323_v63  ;;  %v339_v9 = vmul.f32 %v1213_v62, %v1709_v35  ;;  %v384_v12 = vpop.permute.xlu1 %383 }
  0xf7   : > { %v334_v10 = vsel %vm333_vm9, %v1711_v36, %v332_v4  ;;  %v382_v11 = vpop.permute.xlu0 %381 }
  0xf8   : > { %v1215_v14 = vpop.eup %1214  ;;  %v337_v16 = vsel %vm335_vm11, %v336_v8, %v334_v10  ;;  %1082 = vmatprep.mubr.msk.f32.mxu1 %vm389_vm1, %v382_v11  ;;  %v341_v18 = vsel %vm340_vm12, %v1709_v35, %v339_v9 }
  0xf9   : > { %v1217_v17 = vpop.eup %1216  ;;  %1100 = vmatmul.mubr.msk.f32.gmra.mrb[2].mxu0 %vm511_vm0, %v330_v15  ;;  %1083 = vmatmul.mubr.msk.f32.gmra.mrb[4].mxu1 %vm389_vm1, %v384_v12  ;;  %v346_v19 = vmul.f32 %v1215_v14, %v1717_v41  ;;  %v344_v30 = vsel %vm342_vm14, %v343_v20, %v341_v18 }
  0xfa   : > { %1102 = vmatprep.mubr.msk.f32.mxu0 %vm511_vm0, %v337_v16  ;;  %v353_v24 = vmul.f32 %v1217_v17, %v1715_v40  ;;  %v388_v29 = vpop.permute.xlu1 %387 }
  0xfb   : > { %v348_v25 = vsel %vm347_vm13, %v1717_v41, %v346_v19  ;;  %v386_v26 = vpop.permute.xlu0 %385 }
  0xfc   : > { %v351_v33 = vsel %vm349_vm15, %v350_v23, %v348_v25  ;;  %1085 = vmatprep.mubr.msk.f32.mxu1 %vm389_vm1, %v386_v26  ;;  %v355_v34 = vsel %vm354_vm2, %v1715_v40, %v353_v24 }
  0xfd   : > { %1103 = vmatmul.mubr.msk.f32.gmra.mrb[4].mxu0 %vm511_vm0, %v344_v30  ;;  %1086 = vmatmul.mubr.msk.f32.gmra.mrb[6].mxu1 %vm389_vm1, %v388_v29  ;;  %v358_v38 = vsel %vm356_vm3, %v357_v37, %v355_v34  ;;  %vm882_vm1 = vcmask 523264  }
  0xfe   : > { %1105 = vmatprep.mubr.msk.f32.mxu0 %vm511_vm0, %v351_v33 }
 0x101   : > { %1106 = vmatmul.mubr.msk.f32.gmra.mrb[6].mxu0 %vm511_vm0, %v358_v38 }
 0x1c4   : > { %v1078_v39 = vpop.f32.mrb[0].mxu1 }
 0x1c5   : > { %v472_v42 = vpop.f32.mrb[1].mxu1 }
 0x1c8   : > { %v1098_v43 = vpop.f32.mrb[0].mxu0  ;;  %v1081_v44 = vpop.f32.mrb[2].mxu1 }
 0x1c9   : > { %v608_v45 = vadd.f32 %v1098_v43, %v1078_v39  ;;  %v602_v46 = vpop.f32.mrb[1].mxu0  ;;  %v482_v47 = vpop.f32.mrb[3].mxu1 }
 0x1ca   : > { %v603_v48 = vadd.f32 %v602_v46, %v472_v42  ;;  %v754_v46 = vlaneseq }
 0x1cb   : > { %v1777_v49 = vmax.f32 %v608_v45, 0.0 }
 0x1cc   : > { %v1779_v50 = vmax.f32 %v603_v48, 0.0  ;;  %v1101_v51 = vpop.f32.mrb[2].mxu0  ;;  %v1084_v52 = vpop.f32.mrb[4].mxu1 }
 0x1cd   : > { %v618_v53 = vadd.f32 %v1101_v51, %v1081_v44  ;;  %v612_v54 = vpop.f32.mrb[3].mxu0  ;;  %651 = vadd.xlane.f32.xlu1 %v1777_v49  ;;  %v492_v55 = vpop.f32.mrb[5].mxu1  ;;  %v674_v60 = vmul.f32 %v1777_v49, %v1777_v49 }
 0x1ce   : > { %v613_v56 = vadd.f32 %v612_v54, %v482_v47  ;;  %649 = vadd.xlane.f32.xlu0 %v1779_v50  ;;  %v673_v57 = vmul.f32 %v1779_v50, %v1779_v50 }
 0x1cf   : > { %v1791_v8 = vmax.f32 %v618_v53, 0.0  ;;  %v755_v53 = vshrl.u32 %v754_v46, 7 }
 0x1d0   : > { %v1785_v58 = vmax.f32 %v613_v56, 0.0  ;;  %v1104_v59 = vpop.f32.mrb[4].mxu0  ;;  %v1087_v61 = vpop.f32.mrb[6].mxu1 }
 0x1d1   : > { %v628_v62 = vadd.f32 %v1104_v59, %v1084_v52  ;;  %v622_v63 = vpop.f32.mrb[5].mxu0  ;;  %681 = vadd.xlane.f32.xlu1 %v673_v57  ;;  %v502_v3 = vpop.f32.mrb[7].mxu1  ;;  %v676_v16 = vmul.f32 %v1791_v8, %v1791_v8  ;;  %v779_v59 = vmax.f32 %v1705_v32, 1e-12 }
 0x1d2   : > { %v623_v4 = vadd.f32 %v622_v63, %v492_v55  ;;  %683 = vadd.xlane.f32.xlu0 %v674_v60  ;;  %v675_v7 = vmul.f32 %v1785_v58, %v1785_v58  ;;  %v778_v60 = vmax.f32 %v1699_v28, 1e-12 }
 0x1d3   : > { %v1804_v18 = vmax.f32 %v628_v62, 0.0 }
 0x1d4   : > { %v1107_v9 = vpop.f32.mrb[6].mxu0  ;;  %v1794_v14 = vmax.f32 %v623_v4, 0.0 }
 0x1d5   : > { %v638_v10 = vadd.f32 %v1107_v9, %v1087_v61  ;;  %v632_v11 = vpop.f32.mrb[7].mxu0  ;;  %685 = vadd.xlane.f32.xlu1 %v675_v7  ;;  %v678_v20 = vmul.f32 %v1804_v18, %v1804_v18 }
 0x1d6   : > { %v633_v12 = vadd.f32 %v632_v11, %v502_v3  ;;  %655 = vadd.xlane.f32.xlu0 %v1791_v8  ;;  %v677_v15 = vmul.f32 %v1794_v14, %v1794_v14  ;;  %v756_v3 = vsub.s32 0, %v755_v53  ;;  %v768_v11 = vsub.s32 1, %v755_v53 }
 0x1d7   : > { %v1812_v23 = vmax.f32 %v638_v10, 0.0  ;;  %v753_v10 = vld [vmem:[%s2008_s3] sm:$0x3] }
 0x1d8   : > { %v1802_v17 = vmax.f32 %v633_v12, 0.0 }
 0x1d9   : > { %657 = vadd.xlane.f32.xlu1 %v1794_v14  ;;  %v680_v24 = vmul.f32 %v1812_v23, %v1812_v23 }
 0x1da   : > { %653 = vadd.xlane.f32.xlu0 %v1785_v58  ;;  %v679_v19 = vmul.f32 %v1802_v17, %v1802_v17 }
 0x1dd   : > { %689 = vadd.xlane.f32.xlu1 %v677_v15 }
 0x1de   : > { %687 = vadd.xlane.f32.xlu0 %v676_v16 }
 0x1e1   : > { %661 = vadd.xlane.f32.xlu1 %v1802_v17 }
 0x1e2   : > { %659 = vadd.xlane.f32.xlu0 %v1804_v18 }
 0x1e5   : > { %693 = vadd.xlane.f32.xlu1 %v679_v19 }
 0x1e6   : > { %691 = vadd.xlane.f32.xlu0 %v678_v20 }
 0x1ea   : > { %663 = vadd.xlane.f32.xlu0 %v1812_v23 }
 0x1ee   : > { %695 = vadd.xlane.f32.xlu0 %v680_v24 }
 0x25a   : > { %v652_v25 = vpop.xlane.xlu1 %651 }
 0x25b   : > { %v650_v26 = vpop.xlane.xlu0 %649  ;;  %v666_v29 = vmul.f32 0.025, %v652_v25  ;;  %v1835_v25 = vrot.slane %v753_v10, %v756_v3 }
 0x25c   : > { %v665_v30 = vmul.f32 0.025, %v650_v26 }
 0x25d   : > { %v706_v39 = vmul.f32 %v666_v29, %v666_v29 }
 0x25e   : > { %v705_v33 = vmul.f32 %v665_v30, %v665_v30  ;;  %v682_v34 = vpop.xlane.xlu1 %681  ;;  %v721_v16 = vsub.f32 %v1779_v50, %v665_v30 }
 0x25f   : > { %v697_v37 = vmul.f32 0.025, %v682_v34  ;;  %v684_v38 = vpop.xlane.xlu0 %683 }
 0x260   : > { %v698_v42 = vmul.f32 0.025, %v684_v38 }
 0x261   : > { %v713_v43 = vsub.f32 %v697_v37, %v705_v33  ;;  %v722_v33 = vsub.f32 %v1777_v49, %v666_v29 }
 0x262   : > { %v714_v44 = vsub.f32 %v698_v42, %v706_v39  ;;  %v686_v45 = vpop.xlane.xlu1 %685  ;;  %v1840_v39 = vrot.slane %v753_v10, %v768_v11 }
 0x263   : > { %v729_v47 = vadd.f32 1e-05, %v713_v43  ;;  %v656_v48 = vpop.xlane.xlu0 %655  ;;  %v699_v61 = vmul.f32 0.025, %v686_v45 }
 0x264   : > { %v730_v51 = vadd.f32 1e-05, %v714_v44  ;;  %v1819_v56 = vmul.f32 0.025, %v656_v48 }
 0x265   : > { %1218 = vrsqrt.f32 %v729_v47 }
 0x266   : > { %1220 = vrsqrt.f32 %v730_v51  ;;  %v658_v52 = vpop.xlane.xlu1 %657  ;;  %v708_v32 = vmul.f32 %v1819_v56, %v1819_v56 }
 0x267   : > { %v1817_v54 = vmul.f32 0.025, %v658_v52  ;;  %v654_v55 = vpop.xlane.xlu0 %653  ;;  %1222 = vrsqrt.f32 %v779_v59 }
 0x268   : > { %v1821_v57 = vmul.f32 0.025, %v654_v55  ;;  %1224 = vrsqrt.f32 %v778_v60  ;;  %v781_v55 = vmax.f32 %v1703_v31, 1e-12  ;;  %v782_v31 = vmax.f32 %v1711_v36, 1e-12 }
 0x269   : > { %v709_v4 = vmul.f32 %v1817_v54, %v1817_v54  ;;  %v724_v36 = vsub.f32 %v1791_v8, %v1819_v56 }
 0x26a   : > { %v707_v62 = vmul.f32 %v1821_v57, %v1821_v57  ;;  %v690_v63 = vpop.xlane.xlu1 %689  ;;  %v723_v11 = vsub.f32 %v1785_v58, %v1821_v57  ;;  %v784_v57 = vmax.f32 %v1717_v41, 1e-12 }
 0x26b   : > { %v701_v7 = vmul.f32 0.025, %v690_v63  ;;  %v688_v9 = vpop.xlane.xlu0 %687 }
 0x26c   : > { %v715_v28 = vsub.f32 %v699_v61, %v707_v62  ;;  %v700_v12 = vmul.f32 0.025, %v688_v9 }
 0x26d   : > { %v717_v15 = vsub.f32 %v701_v7, %v709_v4 }
 0x26e   : > { %v731_v19 = vadd.f32 1e-05, %v715_v28  ;;  %v716_v20 = vsub.f32 %v700_v12, %v708_v32  ;;  %v662_v24 = vpop.xlane.xlu1 %661  ;;  %v725_v12 = vsub.f32 %v1794_v14, %v1817_v54 }
 0x26f   : > { %v1219_v26 = vpop.eup %1218  ;;  %v733_v34 = vadd.f32 1e-05, %v717_v15  ;;  %v1838_v37 = vmul.f32 0.025, %v662_v24  ;;  %v660_v38 = vpop.xlane.xlu0 %659  ;;  %v780_v15 = vmax.f32 %v1697_v27, 1e-12 }
 0x270   : > { %v1221_v42 = vpop.eup %1220  ;;  %1226 = vrsqrt.f32 %v731_v19  ;;  %v732_v43 = vadd.f32 1e-05, %v716_v20  ;;  %v1842_v44 = vmul.f32 0.025, %v660_v38  ;;  %v745_v50 = vmul.f32 %v1219_v26, %v721_v16 }
 0x271   : > { %1228 = vrsqrt.f32 %v733_v34  ;;  %v746_v30 = vmul.f32 %v1221_v42, %v722_v33  ;;  %v711_v49 = vmul.f32 %v1838_v37, %v1838_v37  ;;  %v1223_v61 = vpop.eup %1222 }
 0x272   : > { %1230 = vrsqrt.f32 %v732_v43  ;;  %v694_v45 = vpop.xlane.xlu1 %693  ;;  %v758_v46 = vmul.f32 %v1835_v25, %v745_v50  ;;  %v710_v51 = vmul.f32 %v1842_v44, %v1842_v44  ;;  %v1225_v63 = vpop.eup %1224  ;;  %v727_v43 = vsub.f32 %v1802_v17, %v1838_v37 }
 0x273   : > { %v703_v29 = vmul.f32 0.025, %v694_v45  ;;  %v692_v47 = vpop.xlane.xlu0 %691  ;;  %v759_v48 = vmul.f32 %v1835_v25, %v746_v30  ;;  %1232 = vrsqrt.f32 %v781_v55  ;;  %v783_v50 = vmax.f32 %v1709_v35, 1e-12 }
 0x274   : > { %v702_v52 = vmul.f32 0.025, %v692_v47  ;;  %v770_v53 = vadd.f32 %v1840_v39, %v758_v46  ;;  %v726_v45 = vsub.f32 %v1804_v18, %v1842_v44  ;;  %v785_v35 = vmax.f32 %v1715_v40, 1e-12 }
 0x275   : > { %v719_v59 = vsub.f32 %v703_v29, %v711_v49  ;;  %v771_v60 = vadd.f32 %v1840_v39, %v759_v48 }
 0x276   : > { %v718_v62 = vsub.f32 %v702_v52, %v710_v51  ;;  %858 = vrot.lane.b32.xlu0 %v770_v53, %s1415_s30  ;;  %v1862_v32 = vmul.f32 %v1225_v63, %v770_v53 }
 0x277   : > { %v735_v3 = vadd.f32 1e-05, %v719_v59  ;;  %860 = vrot.lane.b32.xlu1 %v771_v60, %s1415_s30  ;;  %v664_v4 = vpop.xlane.xlu0 %663  ;;  %v1855_v7 = vmul.f32 %v1223_v61, %v771_v60 }
 0x278   : > { %v734_v9 = vadd.f32 1e-05, %v718_v62  ;;  %v1857_v10 = vmul.f32 0.025, %v664_v4 }
 0x279   : > { %1234 = vrsqrt.f32 %v735_v3 }
 0x27a   : > { %v1227_v28 = vpop.eup %1226  ;;  %1236 = vrsqrt.f32 %v734_v9  ;;  %812 = vrot.lane.b32.xlu0 %v1855_v7, %s1415_s30  ;;  %v712_v14 = vmul.f32 %v1857_v10, %v1857_v10  ;;  %v728_v60 = vsub.f32 %v1812_v23, %v1857_v10 }
 0x27b   : > { %v1229_v16 = vpop.eup %1228  ;;  %v747_v19 = vmul.f32 %v1227_v28, %v723_v11  ;;  %810 = vrot.lane.b32.xlu1 %v1862_v32, %s1415_s30  ;;  %v696_v58 = vpop.xlane.xlu0 %695  ;;  %1238 = vrsqrt.f32 %v782_v31 }
 0x27c   : > { %v1231_v20 = vpop.eup %1230  ;;  %v704_v54 = vmul.f32 0.025, %v696_v58  ;;  %v749_v24 = vmul.f32 %v1229_v16, %v725_v12  ;;  %1240 = vrsqrt.f32 %v780_v15 }
 0x27d   : > { %v760_v27 = vmul.f32 %v1835_v25, %v747_v19  ;;  %v748_v26 = vmul.f32 %v1231_v20, %v724_v36  ;;  %1242 = vrsqrt.f32 %v784_v57  ;;  %v1233_v42 = vpop.eup %1232 }
 0x27e   : > { %v720_v33 = vsub.f32 %v704_v54, %v712_v14  ;;  %v762_v34 = vmul.f32 %v1835_v25, %v749_v24 }
 0x27f   : > { %v772_v8 = vadd.f32 %v1840_v39, %v760_v27  ;;  %v761_v56 = vmul.f32 %v1835_v25, %v748_v26 }
 0x280   : > { %v736_v41 = vadd.f32 1e-05, %v720_v33  ;;  %v774_v46 = vadd.f32 %v1840_v39, %v762_v34 }
 0x281   : > { %862 = vrot.lane.b32.xlu0 %v772_v8, %s1415_s30  ;;  %v773_v38 = vadd.f32 %v1840_v39, %v761_v56 }
 0x282   : > { %1244 = vrsqrt.f32 %v736_v41 }
 0x283   : > { %v1235_v30 = vpop.eup %1234  ;;  %864 = vrot.lane.b32.xlu1 %v773_v38, %s1415_s30  ;;  %v797_v47 = vmul.f32 %v1233_v42, %v773_v38  ;;  %1246 = vrsqrt.f32 %v783_v50 }
 0x284   : > { %v1237_v49 = vpop.eup %1236  ;;  %v751_v29 = vmul.f32 %v1235_v30, %v727_v43  ;;  %1248 = vrsqrt.f32 %v785_v35 }
 0x285   : > { %866 = vrot.lane.b32.xlu0 %v774_v46, %s1415_s30  ;;  %v750_v48 = vmul.f32 %v1237_v49, %v726_v45  ;;  %v1239_v51 = vpop.eup %1238 }
 0x286   : > { %v764_v17 = vmul.f32 %v1835_v25, %v751_v29  ;;  %v798_v37 = vmul.f32 %v1239_v51, %v774_v46  ;;  %v1241_v18 = vpop.eup %1240 }
 0x287   : > { %816 = vrot.lane.b32.xlu1 %v797_v47, %s1415_s30  ;;  %v1243_v52 = vpop.eup %1242  ;;  %v796_v53 = vmul.f32 %v1241_v18, %v772_v8  ;;  %v763_v55 = vmul.f32 %v1835_v25, %v750_v48 }
 0x288   : > { %v776_v44 = vadd.f32 %v1840_v39, %v764_v17 }
 0x289   : > { %818 = vrot.lane.b32.xlu0 %v798_v37, %s1415_s30  ;;  %v775_v61 = vadd.f32 %v1840_v39, %v763_v55 }
 0x28a   : > { %v800_v59 = vmul.f32 %v1243_v52, %v776_v44 }
 0x28b   : > { %814 = vrot.lane.b32.xlu1 %v796_v53, %s1415_s30 }
 0x28c   : > { %v1245_v40 = vpop.eup %1244 }
 0x28d   : > { %822 = vrot.lane.b32.xlu0 %v800_v59, %s1415_s30  ;;  %v752_v62 = vmul.f32 %v1245_v40, %v728_v60  ;;  %v1247_v3 = vpop.eup %1246 }
 0x28e   : > { %v799_v4 = vmul.f32 %v1247_v3, %v775_v61  ;;  %v1249_v23 = vpop.eup %1248 }
 0x28f   : > { %868 = vrot.lane.b32.xlu1 %v775_v61, %s1415_s30  ;;  %v765_v63 = vmul.f32 %v1835_v25, %v752_v62 }
 0x291   : > { %870 = vrot.lane.b32.xlu0 %v776_v44, %s1415_s30  ;;  %v777_v9 = vadd.f32 %v1840_v39, %v765_v63 }
 0x293   : > { %820 = vrot.lane.b32.xlu1 %v799_v4, %s1415_s30  ;;  %v801_v10 = vmul.f32 %v1249_v23, %v777_v9 }
 0x297   : > { %824 = vrot.lane.b32.xlu1 %v801_v10, %s1415_s30 }
 0x29b   : > { %872 = vrot.lane.b32.xlu1 %v777_v9, %s1415_s30 }
 0x2e8   : > { %v859_v31 = vpop.permute.xlu0 %858 }
 0x2e9   : > { %v861_v11 = vpop.permute.xlu1 %860 }
 0x2ec   : > { %v813_v28 = vpop.permute.xlu0 %812 }
 0x2ed   : > { %v835_v25 = vsel %vm511_vm0, %v1855_v7, %v813_v28  ;;  %v811_v12 = vpop.permute.xlu1 %810 }
 0x2ee   : > { %v843_v39 = vmul.f32 %v835_v25, %v1655_v5  ;;  %v834_v15 = vsel %vm511_vm0, %v1862_v32, %v811_v12 }
 0x2ef   : > { %v842_v16 = vmul.f32 %v834_v15, %v1645_v1 }
 0x2f0   : > { %v884_v36 = vsel %vm882_vm1, %v843_v39, %v861_v11 }
 0x2f1   : > { %v893_v19 = vsel %vm891_vm4, %v884_v36, 0.0  ;;  %v883_v58 = vsel %vm882_vm1, %v842_v16, %v859_v31 }
 0x2f2   : > { %901 = vst [vmem:[%s1919_s6 + $0x8] sm:$0xff] %v893_v19  ;;  %v892_v5 = vsel %vm891_vm4, %v883_v58, 0.0 }
 0x2f3   : > { %900 = vst [vmem:[%s1919_s6] sm:$0xff] %v892_v5  ;;  %v863_v7 = vpop.permute.xlu0 %862 }
 0x2f5   : > { %v865_v32 = vpop.permute.xlu1 %864 }
 0x2f7   : > { %v867_v57 = vpop.permute.xlu0 %866 }
 0x2f9   : > { %v817_v1 = vpop.permute.xlu1 %816 }
 0x2fa   : > { %v837_v20 = vsel %vm511_vm0, %v797_v47, %v817_v1 }
 0x2fb   : > { %v845_v14 = vmul.f32 %v837_v20, %v1648_v2  ;;  %v819_v54 = vpop.permute.xlu0 %818 }
 0x2fc   : > { %v838_v24 = vsel %vm511_vm0, %v798_v37, %v819_v54 }
 0x2fd   : > { %v886_v27 = vsel %vm882_vm1, %v845_v14, %v865_v32  ;;  %v846_v26 = vmul.f32 %v838_v24, %v1667_v13  ;;  %v815_v33 = vpop.permute.xlu1 %814 }
 0x2fe   : > { %v895_v8 = vsel %vm891_vm4, %v886_v27, 0.0  ;;  %v836_v56 = vsel %vm511_vm0, %v796_v53, %v815_v33 }
 0x2ff   : > { %903 = vst [vmem:[%s1919_s6 + $0x18] sm:$0xff] %v895_v8  ;;  %v887_v34 = vsel %vm882_vm1, %v846_v26, %v867_v57  ;;  %v844_v41 = vmul.f32 %v836_v56, %v1642_v0  ;;  %v823_v2 = vpop.permute.xlu0 %822 }
 0x300   : > { %v896_v38 = vsel %vm891_vm4, %v887_v34, 0.0  ;;  %v840_v42 = vsel %vm511_vm0, %v800_v59, %v823_v2 }
 0x301   : > { %904 = vst [vmem:[%s1919_s6 + $0x20] sm:$0xff] %v896_v38  ;;  %v885_v43 = vsel %vm882_vm1, %v844_v41, %v863_v7  ;;  %v848_v13 = vmul.f32 %v840_v42, %v1679_v22  ;;  %v869_v50 = vpop.permute.xlu1 %868 }
 0x302   : > { %v894_v30 = vsel %vm891_vm4, %v885_v43, 0.0 }
 0x303   : > { %902 = vst [vmem:[%s1919_s6 + $0x10] sm:$0xff] %v894_v30  ;;  %v871_v45 = vpop.permute.xlu0 %870 }
 0x304   : > { %v889_v0 = vsel %vm882_vm1, %v848_v13, %v871_v45 }
 0x305   : > { %v898_v46 = vsel %vm891_vm4, %v889_v0, 0.0  ;;  %v821_v49 = vpop.permute.xlu1 %820 }
 0x306   : > { %906 = vst [vmem:[%s1919_s6 + $0x30] sm:$0xff] %v898_v46  ;;  %v839_v29 = vsel %vm511_vm0, %v799_v4, %v821_v49 }
 0x307   : > { %v847_v47 = vmul.f32 %v839_v29, %v1658_v6 }
 0x309   : > { %v888_v22 = vsel %vm882_vm1, %v847_v47, %v869_v50  ;;  %v825_v48 = vpop.permute.xlu1 %824 }
 0x30a   : > { %v897_v51 = vsel %vm891_vm4, %v888_v22, 0.0  ;;  %v841_v17 = vsel %vm511_vm0, %v801_v10, %v825_v48 }
 0x30b   : > { %905 = vst [vmem:[%s1919_s6 + $0x28] sm:$0xff] %v897_v51  ;;  %v849_v35 = vmul.f32 %v841_v17, %v1676_v21 }
 0x30d   : > { %v873_v37 = vpop.permute.xlu1 %872 }
 0x30e   : > { %v890_v6 = vsel %vm882_vm1, %v849_v35, %v873_v37 }
 0x30f   : > { %v899_v18 = vsel %vm891_vm4, %v890_v6, 0.0 }
 0x310   : > { %907 = vst [vmem:[%s1919_s6 + $0x38] sm:$0xff] %v899_v18 }
 0x311   : > { %1349 = shalt.err (!%p1346_p1)
}
 0x312   : > { %s1350_s25 = scalar_lea.hbm %s1956_s29, 1024  ;;  %s1354_s11 = scalar_lea.hbm %s2009_s4, 2048 }
 0x313   : > { %p1351_p13 = scmp.ne.s32.totalorder %s1956_s29, %s1350_s25  ;;  %p1355_p4 = scmp.lt.u32.totalorder %s1956_s29, %s2009_s4 }
 0x314   : > { %p1356_p5 = scmp.lt.u32.totalorder %s1354_s11, %s1350_s25  ;;  %p1358_p11 = scmp.lt.u32.totalorder %s1350_s25, %s1956_s29 }
 0x315   : > { %p1352_p6 = pnand %p1351_p13, %p2023_p0 }
 0x316   : > { %p1357_p8 = por %p1356_p5, %p1355_p4 }
 0x317   : > { %p1353_p10 = pneg %p1352_p6 }
 0x318   : > { %p1359_p2 = por %p1358_p11, %p1357_p8 }
 0x31a   : > { %p1360_p3 = pnand %p1359_p2, %p1353_p10 }
 0x31c   : > { %1363 = shalt.err (!%p1360_p3)
}
 0x31d   : > { %s1417_s6 = smov 128   ;;  %s1418_s7 = smov 8  }
 0x31e   : > { %1138 = dma.vmem_to_hbm [thread:$0]  (%p2023_p0), %s1958_s28, 1024, %s1956_s29, %s909_s19, %s1417_s6, %s1417_s6, %s1418_s7  }
 0x31f PF: > { %s937_s27 = sand.u32 1, %s1394_s15   ;;  %p2024_p7 = scmp.ne.s32.totalorder %s2014_s22, 0 }
 0x320   : > { %p2025_p9 = scmp.ge.s32.totalorder %s1406_s18, 2  ;;  %s938_s20 = scalar_lea.sflag [#allocation4], %s937_s27 }
 0x322   : > { %p1152_p12 = pnand %p2025_p9, %p2024_p7 }
 0x324   : > { %1389 = dma.done.wait (!%p1152_p12), %s938_s20, 1024  }
 0x325   : > { %1391 = vsyncadd (!%p1152_p12), %s938_s20, 4294966272  ;;  %p18_p1 = scmp.ge.s32.totalorder %s1560_s26, 4   ;;  %s2026_s15 = smov %s1398_s16 }
 0x326   : > { %s2027_s16 = smov %s1402_s17  ;;  %s2028_s17 = smov %s1576_s14 }
 0x327   : > { %s2029_s18 = smov %s1560_s26  ;;  %20 = sbr.rel (!%p18_p1) target bundleno = 6 (0x6), region = 89 }
 0x32e   :  { %943 = vsyncpa [#allocation3], 1 }
 0x32f   :  { %945 = vsyncpa [#allocation3 + $0x1], 1 }
 0x330   :  { %946 = vsyncpa [#allocation6], 1 }
 0x331   :  { %947 = vsyncpa [#allocation4], 1 }
 0x332   :  { %949 = vsyncpa [#allocation4 + $0x1], 1 }

</bundles_post_ra>
